<compile_context>
chip_gen: v5e
topology: v5e:2x2
jax: 0.10.0
libtpu: 0.0.40
codegen_flags: <defaults>
</compile_context>

<pallas_src>
import functools

import jax
import jax.numpy as jnp
from jax.experimental import pallas as pl
from jax.experimental.pallas import tpu as pltpu


def _round_up(x, m):
    return (x + m - 1) // m * m


# ---------------------------------------------------------------------------
# Fused Pallas kernel: both branches (online / target), both views (x1 / x2).
# grid = (branch, hw_tile)      branch: parallel, hw_tile: reduction
# ---------------------------------------------------------------------------
def relic_fused_kernel(patches_ref, wconv_ref, w1_ref, w2_ref, out_ref,
                       acc_ref, *, inv_hw):
    h = pl.program_id(1)
    nh = pl.num_programs(1)

    @pl.when(h == 0)
    def _init():
        acc_ref[...] = jnp.zeros_like(acc_ref)

    # Conv2d(3x3, same, bias=False) on this spatial tile as ONE 2-D MXU matmul
    # over the flattened (2B * hw_tile, Kp) im2col patches, bf16 x bf16 -> f32.
    p = patches_ref[...]                                    # (2B, Thw, Kp) bf16
    tb, thw, kp = p.shape
    p2d = p.reshape(tb * thw, kp)
    fmap = jnp.dot(p2d, wconv_ref[0],
                   preferred_element_type=jnp.float32)      # (2B*Thw, Fp) f32
    fmap = jnp.maximum(fmap, 0.0)                           # ReLU
    # partial global-average-pool: accumulate spatial sums per image
    acc_ref[...] += fmap.reshape(tb, thw, -1).sum(axis=1)   # (2B, Fp)

    @pl.when(h == nh - 1)
    def _finalize():
        pooled = acc_ref[...] * inv_hw                      # mean over H*W
        hid = jnp.dot(pooled, w1_ref[0],
                      preferred_element_type=jnp.float32)   # Linear(F, hidden)
        hid = jnp.maximum(hid, 0.0)                         # ReLU
        out_ref[0] = jnp.dot(hid, w2_ref[0],
                             preferred_element_type=jnp.float32)  # Linear(hidden, O)


def relic_fused(patches, wconv_s, w1_s, w2_s, *, hw_true, hw_tile):
    """patches: (2B, HWp, Kp) bf16; weights: (2, Kp, Fp) bf16, (2, Fp, Hm) f32,
    (2, Hm, Op) f32.  Returns (2, 2B, Op) f32 (branch 0 = online, 1 = target)."""
    TB, HWp, Kp = patches.shape
    _, _, Fp = wconv_s.shape
    _, _, Hm = w1_s.shape
    _, _, Op = w2_s.shape
    n_hw = HWp // hw_tile

    kernel = functools.partial(relic_fused_kernel, inv_hw=1.0 / float(hw_true))

    return pl.pallas_call(
        kernel,
        out_shape=jax.ShapeDtypeStruct((2, TB, Op), jnp.float32),
        grid_spec=pltpu.PrefetchScalarGridSpec(
            num_scalar_prefetch=0,
            grid=(2, n_hw),
            in_specs=[
                # patches: shared by both branches, tiled along spatial axis
                pl.BlockSpec((TB, hw_tile, Kp), lambda b, h: (0, h, 0)),
                # per-branch weights (tiny; re-fetched per branch only)
                pl.BlockSpec((1, Kp, Fp), lambda b, h: (b, 0, 0)),
                pl.BlockSpec((1, Fp, Hm), lambda b, h: (b, 0, 0)),
                pl.BlockSpec((1, Hm, Op), lambda b, h: (b, 0, 0)),
            ],
            # lane-dense (Op = multiple of 128) output slab, one block / branch
            out_specs=pl.BlockSpec((1, TB, Op), lambda b, h: (b, 0, 0)),
            scratch_shapes=[pltpu.VMEM((TB, Fp), jnp.float32)],
        ),
        compiler_params=pltpu.CompilerParams(
            dimension_semantics=("parallel", "arbitrary")),
    )(patches, wconv_s, w1_s, w2_s)


# ---------------------------------------------------------------------------
# JAX glue: im2col for 3x3 same conv on NCHW input, weight packing, forward
# ---------------------------------------------------------------------------
def im2col_3x3_same(x_nchw):
    # x: (B, C, H, W) -> patches (B, H*W, 9*C), patch order (kh, kw, c)
    # TODO(synk): for large images, build the 9 conv taps in-kernel from the
    # padded NHWC image (static slices / pltpu.roll) instead of materializing
    # the 9x-expanded im2col patches in HBM.
    B, C, H, W = x_nchw.shape
    x = jnp.transpose(x_nchw, (0, 2, 3, 1))                    # NHWC
    xp = jnp.pad(x, ((0, 0), (1, 1), (1, 1), (0, 0)))
    cols = []
    for kh in range(3):
        for kw in range(3):
            cols.append(xp[:, kh:kh + H, kw:kw + W, :])         # (B, H, W, C)
    patches = jnp.stack(cols, axis=3)                           # (B, H, W, 9, C)
    return patches.reshape(B, H * W, 9 * C)


def make_params(key, C, F, hidden, out_dim):
    k1, k2, k3 = jax.random.split(key, 3)
    # torch-layout conv weight (F, C, 3, 3) lowered to a (9*C, F) matmul weight
    w_conv_t = jax.random.normal(k1, (F, C, 3, 3), jnp.float32) * 0.1
    w_conv = jnp.transpose(w_conv_t, (2, 3, 1, 0)).reshape(9 * C, F)
    w1 = jax.random.normal(k2, (F, hidden), jnp.float32) * 0.05   # Linear(F, hidden)
    w2 = jax.random.normal(k3, (hidden, out_dim), jnp.float32) * 0.05
    return w_conv, w1, w2


def _pad2(a, rows, cols):
    return jnp.pad(a, ((0, rows - a.shape[0]), (0, cols - a.shape[1])))


def pack_branch_params(online_params, target_params, Kp, Fp, Op):
    wc_o, w1_o, w2_o = online_params
    wc_t, w1_t, w2_t = target_params
    Hm = w1_o.shape[1]
    wconv_s = jnp.stack([_pad2(wc_o, Kp, Fp),
                         _pad2(wc_t, Kp, Fp)]).astype(jnp.bfloat16)  # (2, Kp, Fp)
    w1_s = jnp.stack([_pad2(w1_o, Fp, Hm), _pad2(w1_t, Fp, Hm)])     # (2, Fp, Hm)
    w2_s = jnp.stack([_pad2(w2_o, Hm, Op), _pad2(w2_t, Hm, Op)])     # (2, Hm, Op)
    return wconv_s, w1_s, w2_s


def relic_forward(x1_nchw, x2_nchw, online_params, target_params, hw_tile=128):
    B, C, H, W = x1_nchw.shape
    K = 9 * C
    F = online_params[0].shape[1]
    O = online_params[2].shape[1]
    HW = H * W

    Kp = _round_up(K, 128)
    Fp = _round_up(F, 128)
    Op = _round_up(O, 128)

    # stack the two views along batch -> (2B, HW, K)
    patches = jnp.concatenate(
        [im2col_3x3_same(x1_nchw), im2col_3x3_same(x2_nchw)], axis=0)

    # pad spatial dim to a multiple of the tile (zero rows contribute 0 through
    # the bias-free conv + ReLU + sum), pad K to 128 lanes, cast to bf16
    hw_tile = min(hw_tile, _round_up(HW, 8))
    HWp = _round_up(HW, hw_tile)
    patches = jnp.pad(patches, ((0, 0), (0, HWp - HW), (0, Kp - K)))
    patches = patches.astype(jnp.bfloat16)

    wconv_s, w1_s, w2_s = pack_branch_params(online_params, target_params,
                                             Kp, Fp, Op)

    out = relic_fused(patches, wconv_s, w1_s, w2_s, hw_true=HW, hw_tile=hw_tile)

    # branch 0 = online, branch 1 = target (no-grad in torch; pure fn here)
    o1 = out[0, :B, :O]
    o2 = out[0, B:, :O]
    t1 = out[1, :B, :O]
    t2 = out[1, B:, :O]
    return o1, o2, t1, t2


def relic_branch_ref(x_nchw, params):
    # Pure-JAX reference, same bf16 conv-operand precision as the kernel.
    w_conv, w1, w2 = params
    p = im2col_3x3_same(x_nchw)
    fmap = jnp.einsum("bpk,kf->bpf",
                      p.astype(jnp.bfloat16), w_conv.astype(jnp.bfloat16),
                      preferred_element_type=jnp.float32)
    fmap = jnp.maximum(fmap, 0.0)
    pooled = jnp.mean(fmap, axis=1)
    h = jnp.maximum(jnp.dot(pooled, w1, preferred_element_type=jnp.float32), 0.0)
    return jnp.dot(h, w2, preferred_element_type=jnp.float32)


if __name__ == "__main__":
    B, C, H, W = 2, 4, 16, 16       # small NCHW images
    F = 32                          # encoder feature dim (mlp_in_dim)
    HIDDEN = 128                    # mlp_hidden (scaled down from 2048)
    OUT = 64                        # mlp_out_dim (default 64)

    key = jax.random.PRNGKey(0)
    kx1, kx2, kp = jax.random.split(key, 3)
    x1 = jax.random.normal(kx1, (B, C, H, W), jnp.float32)
    x2 = jax.random.normal(kx2, (B, C, H, W), jnp.float32)

    online_params = make_params(kp, C, F, HIDDEN, OUT)
    # deepcopy semantics: target initialized identical to online
    target_params = tuple(jnp.array(p) for p in online_params)

    o1, o2, t1, t2 = relic_forward(x1, x2, online_params, target_params)
    jax.block_until_ready((o1, o2, t1, t2))

    # sanity check vs pure-JAX reference (bf16 conv operands, f32 accumulation)
    r1 = relic_branch_ref(x1, online_params)
    r2 = relic_branch_ref(x2, online_params)
    assert o1.shape == (B, OUT) and t2.shape == (B, OUT)
    assert jnp.allclose(o1, r1, atol=2e-2, rtol=2e-2)
    assert jnp.allclose(o2, r2, atol=2e-2, rtol=2e-2)
    # target == online at init (identical weights, same fused kernel)
    assert jnp.allclose(t1, o1) and jnp.allclose(t2, o2)

    print("KERNEL_OK")
</pallas_src>

<mosaic_0001>
module attributes {stable_mosaic.version = 11 : i64} {
  func.func @relic_fused_kernel(%arg0: i32, %arg1: i32, %arg2: memref<4x128x128xbf16, #tpu.memory_space<vmem>>, %arg3: memref<1x128x128xbf16, #tpu.memory_space<vmem>>, %arg4: memref<1x128x128xf32, #tpu.memory_space<vmem>>, %arg5: memref<1x128x128xf32, #tpu.memory_space<vmem>>, %arg6: memref<1x4x128xf32, #tpu.memory_space<vmem>>, %arg7: memref<4x128xf32, #tpu.memory_space<vmem>>) attributes {dimension_semantics = [#tpu.dimension_semantics<parallel>, #tpu.dimension_semantics<arbitrary>], iteration_bounds = array<i64: 2, 2>, scalar_prefetch = 0 : i64, scratch_operands = 1 : i64, tpu.core_type = #tpu.core_type<tc>, window_params = [{transform_indices = @transform_0, window_bounds = array<i64: 4, 128, 128>}, {transform_indices = @transform_1, window_bounds = array<i64: 1, 128, 128>}, {transform_indices = @transform_2, window_bounds = array<i64: 1, 128, 128>}, {transform_indices = @transform_3, window_bounds = array<i64: 1, 128, 128>}, {transform_indices = @transform_4, window_bounds = array<i64: 1, 4, 128>}]} {
    %c0_i32 = arith.constant 0 : i32
    %0 = arith.cmpi eq, %arg1, %c0_i32 : i32
    %1 = arith.extui %0 : i1 to i32
    %c0_i32_0 = arith.constant 0 : i32
    %2 = arith.cmpi ne, %1, %c0_i32_0 : i32
    scf.if %2 {
      %cst_13 = arith.constant 0.000000e+00 : f32
      %18 = vector.broadcast %cst_13 : f32 to vector<4x128xf32>
      %c0_14 = arith.constant 0 : index
      %c0_15 = arith.constant 0 : index
      %19 = vector.load %arg7[%c0_14, %c0_15] : memref<4x128xf32, #tpu.memory_space<vmem>>, vector<4x128xf32>
      tpu.vector_store %arg7[%c0_14, %c0_15], %18 {strides = array<i32>} : memref<4x128xf32, #tpu.memory_space<vmem>>, vector<4x128xf32>,
    } else {
    }
    %c0 = arith.constant 0 : index
    %c0_1 = arith.constant 0 : index
    %c0_2 = arith.constant 0 : index
    %3 = vector.load %arg2[%c0, %c0_1, %c0_2] : memref<4x128x128xbf16, #tpu.memory_space<vmem>>, vector<4x128x128xbf16>
    %4 = vector.shape_cast %3 : vector<4x128x128xbf16> to vector<512x128xbf16>
    %c0_3 = arith.constant 0 : index
    %c0_4 = arith.constant 0 : index
    %c0_5 = arith.constant 0 : index
    %5 = vector.load %arg3[%c0_3, %c0_4, %c0_5] : memref<1x128x128xbf16, #tpu.memory_space<vmem>>, vector<1x128x128xbf16>
    %6 = vector.shape_cast %5 : vector<1x128x128xbf16> to vector<128x128xbf16>
    %cst = arith.constant dense<0.000000e+00> : vector<512x128xf32>
    %7 = tpu.matmul %4, %6, %cst {dimension_numbers = #tpu.dot_dimension_numbers<[1], [0], [0], [1], [0, 0, 1, 1], [], []>} : vector<512x128xbf16>, vector<128x128xbf16>, vector<512x128xf32> -> vector<512x128xf32>
    %cst_6 = arith.constant 0.000000e+00 : f32
    %8 = vector.broadcast %cst_6 : f32 to vector<512x128xf32>
    %9 = arith.maximumf %7, %8 : vector<512x128xf32>
    %c0_7 = arith.constant 0 : index
    %c0_8 = arith.constant 0 : index
    %10 = vector.load %arg7[%c0_7, %c0_8] : memref<4x128xf32, #tpu.memory_space<vmem>>, vector<4x128xf32>
    %11 = vector.shape_cast %9 : vector<512x128xf32> to vector<4x128x128xf32>
    %cst_9 = arith.constant dense<0.000000e+00> : vector<4x128xf32>
    %12 = vector.multi_reduction <add>, %11, %cst_9 [1] : vector<4x128x128xf32> to vector<4x128xf32>
    %13 = arith.addf %10, %12 : vector<4x128xf32>
    %c0_10 = arith.constant 0 : index
    %c0_11 = arith.constant 0 : index
    %14 = vector.load %arg7[%c0_10, %c0_11] : memref<4x128xf32, #tpu.memory_space<vmem>>, vector<4x128xf32>
    tpu.vector_store %arg7[%c0_10, %c0_11], %13 {strides = array<i32>} : memref<4x128xf32, #tpu.memory_space<vmem>>, vector<4x128xf32>,
    %c1_i32 = arith.constant 1 : i32
    %15 = arith.cmpi eq, %arg1, %c1_i32 : i32
    %16 = arith.extui %15 : i1 to i32
    %c0_i32_12 = arith.constant 0 : i32
    %17 = arith.cmpi ne, %16, %c0_i32_12 : i32
    scf.if %17 {
      %c0_13 = arith.constant 0 : index
      %c0_14 = arith.constant 0 : index
      %18 = vector.load %arg7[%c0_13, %c0_14] : memref<4x128xf32, #tpu.memory_space<vmem>>, vector<4x128xf32>
      %cst_15 = arith.constant 3.906250e-03 : f32
      %19 = vector.broadcast %cst_15 : f32 to vector<4x128xf32>
      %20 = arith.mulf %18, %19 : vector<4x128xf32>
      %c0_16 = arith.constant 0 : index
      %c0_17 = arith.constant 0 : index
      %c0_18 = arith.constant 0 : index
      %21 = vector.load %arg4[%c0_16, %c0_17, %c0_18] : memref<1x128x128xf32, #tpu.memory_space<vmem>>, vector<1x128x128xf32>
      %22 = vector.shape_cast %21 : vector<1x128x128xf32> to vector<128x128xf32>
      %cst_19 = arith.constant dense<0.000000e+00> : vector<4x128xf32>
      %23 = tpu.matmul %20, %22, %cst_19 {dimension_numbers = #tpu.dot_dimension_numbers<[1], [0], [0], [1], [0, 0, 1, 1], [], []>} : vector<4x128xf32>, vector<128x128xf32>, vector<4x128xf32> -> vector<4x128xf32>
      %cst_20 = arith.constant 0.000000e+00 : f32
      %24 = vector.broadcast %cst_20 : f32 to vector<4x128xf32>
      %25 = arith.maximumf %23, %24 : vector<4x128xf32>
      %c0_21 = arith.constant 0 : index
      %c0_22 = arith.constant 0 : index
      %c0_23 = arith.constant 0 : index
      %26 = vector.load %arg5[%c0_21, %c0_22, %c0_23] : memref<1x128x128xf32, #tpu.memory_space<vmem>>, vector<1x128x128xf32>
      %27 = vector.shape_cast %26 : vector<1x128x128xf32> to vector<128x128xf32>
      %cst_24 = arith.constant dense<0.000000e+00> : vector<4x128xf32>
      %28 = tpu.matmul %25, %27, %cst_24 {dimension_numbers = #tpu.dot_dimension_numbers<[1], [0], [0], [1], [0, 0, 1, 1], [], []>} : vector<4x128xf32>, vector<128x128xf32>, vector<4x128xf32> -> vector<4x128xf32>
      %c0_25 = arith.constant 0 : index
      %c0_26 = arith.constant 0 : index
      %c0_27 = arith.constant 0 : index
      %29 = vector.load %arg6[%c0_25, %c0_26, %c0_27] : memref<1x4x128xf32, #tpu.memory_space<vmem>>, vector<1x4x128xf32>
      %30 = vector.shape_cast %29 : vector<1x4x128xf32> to vector<4x128xf32>
      %31 = vector.shape_cast %28 : vector<4x128xf32> to vector<1x4x128xf32>
      tpu.vector_store %arg6[%c0_25, %c0_26, %c0_27], %31 {strides = array<i32>} : memref<1x4x128xf32, #tpu.memory_space<vmem>>, vector<1x4x128xf32>,
    } else {
    }
    return
  }
  func.func @transform_0(%arg0: i32, %arg1: i32) -> (i32, i32, i32) {
    %c0_i32 = arith.constant 0 : i32
    %c0_i32_0 = arith.constant 0 : i32
    %c0_i32_1 = arith.constant 0 : i32
    return %c0_i32, %arg1, %c0_i32_0 : i32, i32, i32
  }
  func.func @transform_1(%arg0: i32, %arg1: i32) -> (i32, i32, i32) {
    %c0_i32 = arith.constant 0 : i32
    %c0_i32_0 = arith.constant 0 : i32
    %c0_i32_1 = arith.constant 0 : i32
    return %arg0, %c0_i32, %c0_i32_0 : i32, i32, i32
  }
  func.func @transform_2(%arg0: i32, %arg1: i32) -> (i32, i32, i32) {
    %c0_i32 = arith.constant 0 : i32
    %c0_i32_0 = arith.constant 0 : i32
    %c0_i32_1 = arith.constant 0 : i32
    return %arg0, %c0_i32, %c0_i32_0 : i32, i32, i32
  }
  func.func @transform_3(%arg0: i32, %arg1: i32) -> (i32, i32, i32) {
    %c0_i32 = arith.constant 0 : i32
    %c0_i32_0 = arith.constant 0 : i32
    %c0_i32_1 = arith.constant 0 : i32
    return %arg0, %c0_i32, %c0_i32_0 : i32, i32, i32
  }
  func.func @transform_4(%arg0: i32, %arg1: i32) -> (i32, i32, i32) {
    %c0_i32 = arith.constant 0 : i32
    %c0_i32_0 = arith.constant 0 : i32
    %c0_i32_1 = arith.constant 0 : i32
    return %arg0, %c0_i32, %c0_i32_0 : i32, i32, i32
  }
}

</mosaic_0001>

<bundles_post_ra>
// kernel: tpu_custom_call.1
= control target key start
LH: loop header
LB: loop body
LE: loop exit
PB: predicated region body
PF: predicated region fallthrough
CT: control target
= control target key end

     0   :  { %s2278_s0 = inlined_call_operand.hbm [shape: bf16[4,256,128], index: 0, kind: input, shape index: {}]   ;;  %s2279_s1 = inlined_call_operand.hbm [shape: bf16[2,128,128], index: 1, kind: input, shape index: {}]   ;;  %s2280_s2 = inlined_call_operand.hbm [shape: f32[2,128,128], index: 2, kind: input, shape index: {}]   ;;  %s2281_s3 = inlined_call_operand.hbm [shape: f32[2,128,128], index: 3, kind: input, shape index: {}]   ;;  %s2282_s4 = inlined_call_operand.hbm [shape: f32[2,4,128], index: 4, kind: output, shape index: {}]  }
   0x1   :  { %2293 = sst [smem:[#allocation29_spill]] %s2278_s0 }
   0x2   :  { %2294 = sst [smem:[#allocation30_spill]] %s2282_s4 }
   0x3   :  { %9 = vsyncpa [#allocation4], 0 }
   0x4   :  { %11 = vsyncpa [#allocation4 + $0x1], 0 }
   0x5   :  { %12 = vsyncpa [#allocation7], 0 }
   0x6   :  { %14 = vsyncpa [#allocation7 + $0x1], 0 }
   0x7   :  { %15 = vsyncpa [#allocation10], 0 }
   0x8   :  { %17 = vsyncpa [#allocation10 + $0x1], 0 }
   0x9   :  { %18 = vsyncpa [#allocation5], 0 }
   0xa   :  { %20 = vsyncpa [#allocation5 + $0x1], 0  ;;  %s1909_s15 = smov 0   ;;  %s1911_s16 = smov 0  }
   0xb   :  { %s1913_s17 = smov 0   ;;  %s1915_s18 = smov 0  }
   0xc   :  { %s1917_s19 = smov 0   ;;  %s1919_s20 = smov 0  }
   0xd   :  { %s1921_s21 = smov 0   ;;  %s1923_s22 = smov 0  }
   0xe   :  { %s1925_s23 = smov 0   ;;  %s1927_s24 = smov 0  }
   0xf   :  { %s1929_s25 = smov 0  }
  0x10 LB: > { %2295 = sst [smem:[#allocation19_spill]] %s1831_s15  ;;  %s1963_s26 = sadd.s32 4294967295, %s1871_s25   ;;  %s1871_s25 = sphi %s1929_s25, %s26_s25   ;;  %s1867_s24 = sphi %s1927_s24, %s2328_s24   ;;  %s1863_s23 = sphi %s1925_s23, %s2321_s23   ;;  %s1859_s22 = sphi %s1923_s22, %s2327_s22   ;;  %s1855_s21 = sphi %s1921_s21, %s2320_s21   ;;  %s1851_s20 = sphi %s1919_s20, %s2319_s20   ;;  %s1847_s19 = sphi %s1917_s19, %s2326_s19   ;;  %s1843_s18 = sphi %s1915_s18, %s2325_s18   ;;  %s1839_s17 = sphi %s1913_s17, %s2317_s17   ;;  %s1835_s16 = sphi %s1911_s16, %s2324_s16   ;;  %s1831_s15 = sphi %s1909_s15, %s2323_s15  }
  0x11   : > { %2296 = sst [smem:[#allocation20_spill]] %s1839_s17  ;;  %s1279_s27 = sadd.s32 4294967294, %s1871_s25  }
  0x12   : > { %2297 = sst [smem:[#allocation21_spill]] %s1851_s20  ;;  %s35_s28 = sadd.s32 1, %s1863_s23 }
  0x13   : > { %2298 = sst [smem:[#allocation22_spill]] %s1863_s23  ;;  %s38_s29 = sadd.s32 1, %s1867_s24 }
  0x14   : > { %p36_p0 = scmp.ge.s32.totalorder %s35_s28, 2  ;;  %s45_s30 = sadd.s32 1, %s1851_s20 }
  0x15   : > { %p52_p1 = scmp.ne.s32.totalorder %s1851_s20, %s1847_s19  ;;  %p53_p2 = scmp.eq.s32.totalorder %s1871_s25, 0 }
  0x16   : > { %s2330_s28 = smov (%p36_p0, %s35_s28), 0  ;;  %s2332_s29 = smov (!%p36_p0, %s38_s29), %s1867_s24 }
  0x17   : > { %2299 = sst [smem:[#allocation23_spill]] %s2330_s28  ;;  %s42_s5 = ssub.s32 %s1863_s23, %s2330_s28 }
  0x18   : > { %p1979_p3 = por %p53_p2, %p52_p1  ;;  %p40_p4 = scmp.ge.s32.totalorder %s2332_s29, 2 }
  0x19   : > { %p43_p5 = scmp.eq.s32.totalorder %s42_s5, 0  ;;  %p58_p6 = scmp.ne.s32.totalorder %s1847_s19, %s1843_s18 }
  0x1a   : > { %p59_p7 = scmp.eq.s32.totalorder %s1963_s26, 0  ;;  %s2334_s29 = smov (%p40_p4, %s2332_s29), 0 }
  0x1b   : > { %2301 = sst [smem:[#allocation24_spill]] %s2334_s29  ;;  %s68_s9 = ssub.s32 %s1867_s24, %s2334_s29 }
  0x1c   : > { %s1988_s7 = scalar_select %p43_p5, %s1851_s20, %s45_s30  }
  0x1d   : > { %p1990_p8 = por %p59_p7, %p58_p6  ;;  %p69_p9 = scmp.eq.s32.totalorder %s68_s9, 0 }
  0x1e   : > { %2302 = sst [smem:[#allocation25_spill]] %s1988_s7  ;;  %s71_s10 = sadd.s32 1, %s1839_s17 }
  0x1f   : > { %p78_p10 = scmp.ne.s32.totalorder %s1839_s17, %s1835_s16  ;;  %p84_p11 = scmp.ne.s32.totalorder %s1835_s16, %s1831_s15 }
  0x20   : > { %s2002_s11 = scalar_select %p69_p9, %s1839_s17, %s71_s10  }
  0x21   : > { %p2006_p12 = por %p78_p10, %p53_p2  ;;  %p2010_p13 = por %p84_p11, %p59_p7 }
  0x22   : > { %2304 = sst [smem:[#allocation26_spill]] %s2002_s11  ;;  %p160_p0 = scmp.eq.s32.totalorder %s1963_s26, 3 }
  0x23   : > { %p166_p1 = scmp.eq.s32.totalorder %s1279_s27, 3  ;;  %p1281_p6 = scmp.ge.s32.totalorder %s1871_s25, 4 }
  0x24   : > { %p2015_p4 = por %p160_p0, %p78_p10 }
  0x25   : > { %p2019_p5 = por %p166_p1, %p84_p11  ;;  %182 = sbr.rel (%p1281_p6) target bundleno = 71 (0x47), region = 16 }
  0x26   : > { %s2307_s14 = scalar_select %p2015_p4, 1, 0 }
  0x27   : > { %s2309_s18 = scalar_select %p2019_p5, 1, 0 }
  0x28   : > { %2308 = sst [smem:[#allocation27_spill]] %s2307_s14 }
  0x29   : > { %2310 = sst [smem:[#allocation28_spill]] %s2309_s18 }
  0x2a   : > { %s186_s30 = sand.u32 1, %s1851_s20   ;;  %s1468_s5 = sshll.u32 %s1863_s23, 6 }
  0x2b   : > { %s1282_s27 = sshll.u32 %s186_s30, 8  ;;  %s2311_s0 = sld [smem:[#allocation29_spill]] }
  0x2c   : > { %s1536_s28 = scalar_select %p1979_p3, [#allocation0], [#allocation14] }
  0x2d   : > { %s190_s11 = scalar_lea.vmem [#allocation3], %s1282_s27  ;;  %s1873_s20 = smov 2048  }
  0x2e   : > { %s210_s18 = sshll.u32 %s190_s11, 4  ;;  %s200_s15 = sld [smem:[%s1536_s28]]   ;;  %s211_s18 = int_to_ptr.vmem [resolvable:$true] %s210_s18 }
  0x2f   : > { %1537 = sst [smem:[#allocation13]] (%p1979_p3), %s1873_s20  ;;  %s1874_s23 = smov 1024  }
  0x30   : > { %1538 = sst [smem:[#allocation13 + $0x1]] (%p1979_p3), %s1874_s23  ;;  %s1875_s9 = smov 16  }
  0x31   : > { %s195_s29 = scalar_lea.hbm %s2311_s0, %s1468_s5  ;;  %1539 = sst [smem:[#allocation13 + $0x2]] (%p1979_p3), %s1875_s9 }
  0x32   : > { %s208_s7 = sshll.u32 %s195_s29, 4  ;;  %s1876_s5 = smov 64   ;;  %s209_s7 = int_to_ptr.hbm [resolvable:$true] %s208_s7 }
  0x33   : > { %1540 = sst [smem:[#allocation13 + $0x3]] (%p1979_p3), %s1876_s5  ;;  %s1877_s28 = smov 4  }
  0x34   : > { %s1285_s29 = sshll.u32 %s200_s15, 26  ;;  %1541 = sst [smem:[#allocation13 + $0x4]] (%p1979_p3), %s1876_s5 }
  0x35   : > { %s1286_s11 = sadd.s32 134217728, %s1285_s29  ;;  %1542 = sst [smem:[#allocation13 + $0x5]] (%p1979_p3), %s1877_s28 }
  0x36   : > { %s187_s27 = scalar_lea.sflag [#allocation4], %s186_s30  ;;  %s1878_s10 = smov [#allocation12]  }
  0x37   : > { %1543 = dma.general (%p1979_p3), %s209_s7, 4096, %s211_s18, %s187_s27, %s1878_s10, [#allocation13], %s1286_s11, 0  }
  0x38   : > { %s233_s20 = sand.u32 1, %s1871_s25   ;;  %s2047_s23 = sand.u32 1, %s1839_s17  }
  0x39   : > { %s1287_s15 = sshll.u32 %s2047_s23, 6  ;;  %s1469_s9 = sshll.u32 %s1867_s24, 6 }
  0x3a   : > { %s242_s28 = scalar_lea.hbm %s2279_s1, %s1469_s9  ;;  %s237_s30 = scalar_lea.vmem [#allocation6], %s1287_s15 }
  0x3b   : > { %s245_s0 = sshll.u32 %s237_s30, 4  ;;  %s243_s6 = sshll.u32 %s242_s28, 4  ;;  %s246_s0 = int_to_ptr.vmem [resolvable:$true] %s245_s0  ;;  %s244_s6 = int_to_ptr.hbm [resolvable:$true] %s243_s6 }
  0x3c   : > { %s1290_s7 = sshll.u32 %s2047_s23, 7  ;;  %s234_s18 = scalar_lea.sflag [#allocation7], %s233_s20 }
  0x3d   : > { %s1879_s11 = smov 64   ;;  %s1880_s27 = smov 4  }
  0x3e   : > { %1544 = dma.hbm_to_vmem [thread:$0]  (%p2006_p12), %s244_s6, 1024, %s246_s0, %s234_s18, %s1879_s11, %s1879_s11, %s1880_s27  }
  0x3f   : > { %s1470_s10 = sshll.u32 %s1867_s24, 7  ;;  %s259_s9 = scalar_lea.vmem [#allocation8], %s1290_s7 }
  0x40   : > { %s264_s14 = scalar_lea.hbm %s2280_s2, %s1470_s10  ;;  %s267_s15 = sshll.u32 %s259_s9, 4  ;;  %s268_s15 = int_to_ptr.vmem [resolvable:$true] %s267_s15 }
  0x41   : > { %s265_s5 = sshll.u32 %s264_s14, 4  ;;  %s1881_s29 = smov 128   ;;  %s266_s5 = int_to_ptr.hbm [resolvable:$true] %s265_s5 }
  0x42   : > { %s1882_s28 = smov 8   ;;  %s286_s0 = scalar_lea.hbm %s2281_s3, %s1470_s10 }
  0x43   : > { %1545 = dma.hbm_to_vmem [thread:$0]  (%p2006_p12), %s266_s5, 2048, %s268_s15, %s234_s18, %s1881_s29, %s1881_s29, %s1882_s28  }
  0x44   : > { %s287_s6 = sshll.u32 %s286_s0, 4  ;;  %s281_s11 = scalar_lea.vmem [#allocation9], %s1290_s7  ;;  %s288_s6 = int_to_ptr.hbm [resolvable:$true] %s287_s6 }
  0x45   : > { %s289_s27 = sshll.u32 %s281_s11, 4  ;;  %s278_s4 = scalar_lea.sflag [#allocation10], %s2047_s23  ;;  %s290_s27 = int_to_ptr.vmem [resolvable:$true] %s289_s27 }
  0x46   : > { %1546 = dma.hbm_to_vmem [thread:$0]  (%p2006_p12), %s288_s6, 2048, %s290_s27, %s278_s4, %s1881_s29, %s1881_s29, %s1882_s28  }
  0x47 PF: > { %p1296_p2 = scmp.ge.s32.totalorder %s1871_s25, 1  ;;  %p297_p3 = scmp.lt.s32.totalorder %s1871_s25, 5 }
  0x49   : > { %p298_p7 = pnand %p1296_p2, %p297_p3 }
  0x4a   : > { %s303_s17 = sand.u32 (!%p298_p7), 1, %s1847_s19  }
  0x4b   : > { %301 = sbr.rel (%p298_p7) target bundleno = 710 (0x2c6), region = 36  ;;  %s1297_s14 = sshll.u32 (!%p298_p7), %s303_s17, 8 }
  0x4c   : > { %s304_s18 = scalar_lea.sflag (!%p298_p7), [#allocation4], %s303_s17  ;;  %s2072_s10 = scalar_lea.vmem (!%p298_p7), [#allocation3], %s1297_s14 }
  0x50   : > { %1814 = dma.done.wait (%p1990_p8), %s304_s18, 4096  }
  0x51   : > { %1816 = vsyncadd (%p1990_p8), %s304_s18, 4294963200  ;;  %s313_s12 = sand.u32 1, %s1963_s26   ;;  %s2080_s23 = sand.u32 1, %s1835_s16  }
  0x52   : > { %s1298_s7 = sshll.u32 %s2080_s23, 6  ;;  %s314_s9 = scalar_lea.sflag [#allocation7], %s313_s12 }
  0x53   : > { %s2083_s15 = scalar_lea.vmem [#allocation6], %s1298_s7 }
  0x54   : > { %1818 = dma.done.wait (%p2010_p13), %s314_s9, 3072  }
  0x55   : > { %1820 = vsyncadd (%p2010_p13), %s314_s9, 4294964224  ;;  %s1299_s8 = sshll.u32 %s2080_s23, 7  ;;  %s334_s29 = scalar_lea.sflag [#allocation10], %s2080_s23 }
  0x56   : > { %s2090_s5 = scalar_lea.vmem [#allocation8], %s1299_s8  ;;  %s2093_s26 = scalar_lea.vmem [#allocation9], %s1299_s8 }
  0x57   : > { %1822 = dma.done.wait (%p2010_p13), %s334_s29, 2048  }
  0x58   : > { %1824 = vsyncadd (%p2010_p13), %s334_s29, 4294965248  ;;  %s1301_s28 = sshll.u32 %s2080_s23, 2  ;;  %p1302_p8 = scmp.ne.s32.totalorder %s1855_s21, 0 }
  0x59   : > { %s2100_s20 = scalar_lea.vmem [#allocation11], %s1301_s28 }
  0x5a   : > { %382 = sbr.rel (%p1302_p8) target bundleno = 97 (0x61), region = 56 }
  0x5f   : > { %v1883_v0 = vmov 0.0  }
  0x60   : > { %383 = vst [vmem:[#allocation2] sm:$0xf] %v1883_v0 }
  0x61 PF: > { %v1511_v1 = vld [vmem:[%s2083_s15 + $0x38] sm:$0xff]  ;;  %v1510_v2 = vld [vmem:[%s2083_s15 + $0x30] sm:$0xff]  ;;  %v1509_v3 = vld [vmem:[%s2083_s15 + $0x28] sm:$0xff]  ;;  %vm1026_vm0 = vcmask 1041409   ;;  %vm1028_vm1 = vcmask 1042434   ;;  %vm1030_vm2 = vcmask 1043459  }
  0x62   : > { %704 = vmatpush.bf16.msra.mxu0 %v1511_v1  ;;  %1512 = vmatpush.bf16.msra.mxu1 %v1511_v1  ;;  %v1508_v4 = vld [vmem:[%s2083_s15 + $0x20] sm:$0xff]  ;;  %v1507_v5 = vld [vmem:[%s2083_s15 + $0x18] sm:$0xff]  ;;  %v1506_v6 = vld [vmem:[%s2083_s15 + $0x10] sm:$0xff]  ;;  %p1463_p9 = scmp.ne.s32.totalorder %s1855_s21, 1 }
  0x63   : > { %1513 = vmatpush.bf16.msra.mxu2 %v1511_v1  ;;  %1514 = vmatpush.bf16.msra.mxu3 %v1511_v1  ;;  %v1505_v7 = vld [vmem:[%s2083_s15 + $0x8] sm:$0xff]  ;;  %v1504_v8 = vld [vmem:[%s2083_s15] sm:$0xff]  ;;  %v1474_v17 = vld [vmem:[%s2072_s10 + $0x10] sm:$0xff] }
  0x64   : > { %v1472_v9 = vld [vmem:[%s2072_s10] sm:$0xff]  ;;  %v1473_v13 = vld [vmem:[%s2072_s10 + $0x8] sm:$0xff]  ;;  %v1482_v18 = vld [vmem:[%s2072_s10 + $0x50] sm:$0xff] }
  0x65   : > { %v1480_v10 = vld [vmem:[%s2072_s10 + $0x40] sm:$0xff]  ;;  %v1481_v14 = vld [vmem:[%s2072_s10 + $0x48] sm:$0xff]  ;;  %v1490_v19 = vld [vmem:[%s2072_s10 + $0x90] sm:$0xff] }
  0x66   : > { %705 = vmatpush.bf16.msra.mxu0 %v1510_v2  ;;  %1515 = vmatpush.bf16.msra.mxu1 %v1510_v2  ;;  %v1488_v11 = vld [vmem:[%s2072_s10 + $0x80] sm:$0xff]  ;;  %v1489_v15 = vld [vmem:[%s2072_s10 + $0x88] sm:$0xff]  ;;  %v1498_v20 = vld [vmem:[%s2072_s10 + $0xd0] sm:$0xff] }
  0x67   : > { %1516 = vmatpush.bf16.msra.mxu2 %v1510_v2  ;;  %1517 = vmatpush.bf16.msra.mxu3 %v1510_v2  ;;  %v1496_v12 = vld [vmem:[%s2072_s10 + $0xc0] sm:$0xff]  ;;  %v1497_v16 = vld [vmem:[%s2072_s10 + $0xc8] sm:$0xff]  ;;  %v1475_v21 = vld [vmem:[%s2072_s10 + $0x18] sm:$0xff] }
  0x68   : > { %v1483_v22 = vld [vmem:[%s2072_s10 + $0x58] sm:$0xff]  ;;  %v1476_v25 = vld [vmem:[%s2072_s10 + $0x20] sm:$0xff]  ;;  %v1477_v29 = vld [vmem:[%s2072_s10 + $0x28] sm:$0xff] }
  0x69   : > { %v1491_v23 = vld [vmem:[%s2072_s10 + $0x98] sm:$0xff]  ;;  %v1484_v26 = vld [vmem:[%s2072_s10 + $0x60] sm:$0xff]  ;;  %v1485_v30 = vld [vmem:[%s2072_s10 + $0x68] sm:$0xff] }
  0x6a   : > { %706 = vmatpush.bf16.msra.mxu0 %v1509_v3  ;;  %1518 = vmatpush.bf16.msra.mxu1 %v1509_v3  ;;  %v1499_v24 = vld [vmem:[%s2072_s10 + $0xd8] sm:$0xff]  ;;  %v1492_v27 = vld [vmem:[%s2072_s10 + $0xa0] sm:$0xff]  ;;  %v1493_v31 = vld [vmem:[%s2072_s10 + $0xa8] sm:$0xff] }
  0x6b   : > { %1519 = vmatpush.bf16.msra.mxu2 %v1509_v3  ;;  %1520 = vmatpush.bf16.msra.mxu3 %v1509_v3  ;;  %v1500_v28 = vld [vmem:[%s2072_s10 + $0xe0] sm:$0xff]  ;;  %v1501_v32 = vld [vmem:[%s2072_s10 + $0xe8] sm:$0xff]  ;;  %v1478_v33 = vld [vmem:[%s2072_s10 + $0x30] sm:$0xff] }
  0x6c   : > { %v1486_v34 = vld [vmem:[%s2072_s10 + $0x70] sm:$0xff]  ;;  %v1479_v37 = vld [vmem:[%s2072_s10 + $0x38] sm:$0xff] }
  0x6d   : > { %v1494_v35 = vld [vmem:[%s2072_s10 + $0xb0] sm:$0xff]  ;;  %v1487_v38 = vld [vmem:[%s2072_s10 + $0x78] sm:$0xff] }
  0x6e   : > { %707 = vmatpush.bf16.msra.mxu0 %v1508_v4  ;;  %1521 = vmatpush.bf16.msra.mxu1 %v1508_v4  ;;  %v1502_v36 = vld [vmem:[%s2072_s10 + $0xf0] sm:$0xff]  ;;  %v1495_v39 = vld [vmem:[%s2072_s10 + $0xb8] sm:$0xff] }
  0x6f   : > { %1522 = vmatpush.bf16.msra.mxu2 %v1508_v4  ;;  %1523 = vmatpush.bf16.msra.mxu3 %v1508_v4  ;;  %v1503_v40 = vld [vmem:[%s2072_s10 + $0xf8] sm:$0xff] }
  0x72   : > { %708 = vmatpush.bf16.msra.mxu0 %v1507_v5  ;;  %1524 = vmatpush.bf16.msra.mxu1 %v1507_v5 }
  0x73   : > { %1525 = vmatpush.bf16.msra.mxu2 %v1507_v5  ;;  %1526 = vmatpush.bf16.msra.mxu3 %v1507_v5 }
  0x76   : > { %709 = vmatpush.bf16.msra.mxu0 %v1506_v6  ;;  %1527 = vmatpush.bf16.msra.mxu1 %v1506_v6 }
  0x77   : > { %1528 = vmatpush.bf16.msra.mxu2 %v1506_v6  ;;  %1529 = vmatpush.bf16.msra.mxu3 %v1506_v6 }
  0x7a   : > { %710 = vmatpush.bf16.msra.mxu0 %v1505_v7  ;;  %1530 = vmatpush.bf16.msra.mxu1 %v1505_v7 }
  0x7b   : > { %1531 = vmatpush.bf16.msra.mxu2 %v1505_v7  ;;  %1532 = vmatpush.bf16.msra.mxu3 %v1505_v7 }
  0x7e   : > { %711 = vmatpush.bf16.msra.mxu0 %v1504_v8  ;;  %1533 = vmatpush.bf16.msra.mxu1 %v1504_v8 }
  0x7f   : > { %1534 = vmatpush.bf16.msra.mxu2 %v1504_v8  ;;  %1535 = vmatpush.bf16.msra.mxu3 %v1504_v8 }
  0x81   : > { %712 = vmatmul.bf16.vlgmr.msra.gmra.mxu0 %v1472_v9  ;;  %752 = vmatmul.bf16.vlgmr.msra.gmra.mxu1 %v1480_v10 }
  0x82   : > { %792 = vmatmul.bf16.vlgmr.msra.gmra.mxu2 %v1488_v11  ;;  %832 = vmatmul.bf16.vlgmr.msra.gmra.mxu3 %v1496_v12 }
  0x91   : > { %717 = vmatmul.bf16.gmra.mxu0 %v1473_v13  ;;  %757 = vmatmul.bf16.gmra.mxu1 %v1481_v14 }
  0x92   : > { %797 = vmatmul.bf16.gmra.mxu2 %v1489_v15  ;;  %837 = vmatmul.bf16.gmra.mxu3 %v1497_v16 }
  0xa1   : > { %722 = vmatmul.bf16.gmra.mxu0 %v1474_v17  ;;  %762 = vmatmul.bf16.gmra.mxu1 %v1482_v18 }
  0xa2   : > { %802 = vmatmul.bf16.gmra.mxu2 %v1490_v19  ;;  %842 = vmatmul.bf16.gmra.mxu3 %v1498_v20 }
  0xb1   : > { %727 = vmatmul.bf16.gmra.mxu0 %v1475_v21  ;;  %767 = vmatmul.bf16.gmra.mxu1 %v1483_v22 }
  0xb2   : > { %807 = vmatmul.bf16.gmra.mxu2 %v1491_v23  ;;  %847 = vmatmul.bf16.gmra.mxu3 %v1499_v24 }
  0xc1   : > { %732 = vmatmul.bf16.gmra.mxu0 %v1476_v25  ;;  %772 = vmatmul.bf16.gmra.mxu1 %v1484_v26 }
  0xc2   : > { %812 = vmatmul.bf16.gmra.mxu2 %v1492_v27  ;;  %852 = vmatmul.bf16.gmra.mxu3 %v1500_v28 }
  0xd1   : > { %737 = vmatmul.bf16.gmra.mxu0 %v1477_v29  ;;  %777 = vmatmul.bf16.gmra.mxu1 %v1485_v30 }
  0xd2   : > { %817 = vmatmul.bf16.gmra.mxu2 %v1493_v31  ;;  %857 = vmatmul.bf16.gmra.mxu3 %v1501_v32 }
  0xe1   : > { %742 = vmatmul.bf16.gmra.mxu0 %v1478_v33  ;;  %782 = vmatmul.bf16.gmra.mxu1 %v1486_v34 }
  0xe2   : > { %822 = vmatmul.bf16.gmra.mxu2 %v1494_v35  ;;  %862 = vmatmul.bf16.gmra.mxu3 %v1502_v36 }
  0xf1   : > { %747 = vmatmul.bf16.gmra.mxu0 %v1479_v37  ;;  %787 = vmatmul.bf16.gmra.mxu1 %v1487_v38 }
  0xf2   : > { %827 = vmatmul.bf16.gmra.mxu2 %v1495_v39  ;;  %867 = vmatmul.bf16.gmra.mxu3 %v1503_v40 }
  0xfe   : > { %v713_v41 = vpop.f32.mrf.mxu0  ;;  %v753_v42 = vpop.f32.mrf.mxu1 }
  0xff   : > { %v873_v47 = vmax.f32 %v713_v41, 0.0  ;;  %v889_v48 = vmax.f32 %v753_v42, 0.0 }
 0x105   : > { %v793_v43 = vpop.f32.mrf.mxu2  ;;  %v833_v44 = vpop.f32.mrf.mxu3 }
 0x106   : > { %v715_v45 = vpop.f32.mrf.mxu0  ;;  %v755_v46 = vpop.f32.mrf.mxu1  ;;  %v905_v55 = vmax.f32 %v793_v43, 0.0  ;;  %v921_v56 = vmax.f32 %v833_v44, 0.0 }
 0x107   : > { %v874_v49 = vmax.f32 %v715_v45, 0.0  ;;  %v890_v50 = vmax.f32 %v755_v46, 0.0 }
 0x109   : > { %v938_v51 = vadd.f32 %v874_v49, %v873_v47  ;;  %v959_v52 = vadd.f32 %v890_v50, %v889_v48 }
 0x10d   : > { %v795_v53 = vpop.f32.mrf.mxu2  ;;  %v835_v54 = vpop.f32.mrf.mxu3 }
 0x10e   : > { %v906_v57 = vmax.f32 %v795_v53, 0.0  ;;  %v922_v58 = vmax.f32 %v835_v54, 0.0  ;;  %v718_v59 = vpop.f32.mrf.mxu0  ;;  %v758_v60 = vpop.f32.mrf.mxu1 }
 0x10f   : > { %v875_v61 = vmax.f32 %v718_v59, 0.0  ;;  %v891_v62 = vmax.f32 %v758_v60, 0.0 }
 0x110   : > { %v980_v63 = vadd.f32 %v906_v57, %v905_v55  ;;  %v1001_v0 = vadd.f32 %v922_v58, %v921_v56 }
 0x111   : > { %v939_v1 = vadd.f32 %v938_v51, %v875_v61  ;;  %v960_v2 = vadd.f32 %v959_v52, %v891_v62 }
 0x115   : > { %v798_v3 = vpop.f32.mrf.mxu2  ;;  %v838_v4 = vpop.f32.mrf.mxu3 }
 0x116   : > { %v907_v5 = vmax.f32 %v798_v3, 0.0  ;;  %v923_v6 = vmax.f32 %v838_v4, 0.0  ;;  %v720_v7 = vpop.f32.mrf.mxu0  ;;  %v760_v8 = vpop.f32.mrf.mxu1 }
 0x117   : > { %v876_v9 = vmax.f32 %v720_v7, 0.0  ;;  %v892_v10 = vmax.f32 %v760_v8, 0.0 }
 0x118   : > { %v981_v11 = vadd.f32 %v980_v63, %v907_v5  ;;  %v1002_v12 = vadd.f32 %v1001_v0, %v923_v6 }
 0x119   : > { %v940_v13 = vadd.f32 %v939_v1, %v876_v9  ;;  %v961_v14 = vadd.f32 %v960_v2, %v892_v10 }
 0x11d   : > { %v800_v15 = vpop.f32.mrf.mxu2  ;;  %v840_v16 = vpop.f32.mrf.mxu3 }
 0x11e   : > { %v908_v17 = vmax.f32 %v800_v15, 0.0  ;;  %v924_v18 = vmax.f32 %v840_v16, 0.0  ;;  %v723_v19 = vpop.f32.mrf.mxu0  ;;  %v763_v20 = vpop.f32.mrf.mxu1 }
 0x11f   : > { %v877_v21 = vmax.f32 %v723_v19, 0.0  ;;  %v893_v22 = vmax.f32 %v763_v20, 0.0 }
 0x120   : > { %v982_v23 = vadd.f32 %v981_v11, %v908_v17  ;;  %v1003_v24 = vadd.f32 %v1002_v12, %v924_v18 }
 0x121   : > { %v941_v25 = vadd.f32 %v940_v13, %v877_v21  ;;  %v962_v26 = vadd.f32 %v961_v14, %v893_v22 }
 0x125   : > { %v803_v27 = vpop.f32.mrf.mxu2  ;;  %v843_v28 = vpop.f32.mrf.mxu3 }
 0x126   : > { %v909_v29 = vmax.f32 %v803_v27, 0.0  ;;  %v925_v30 = vmax.f32 %v843_v28, 0.0  ;;  %v725_v31 = vpop.f32.mrf.mxu0  ;;  %v765_v32 = vpop.f32.mrf.mxu1 }
 0x127   : > { %v878_v63 = vmax.f32 %v725_v31, 0.0  ;;  %v894_v0 = vmax.f32 %v765_v32, 0.0 }
 0x128   : > { %v983_v33 = vadd.f32 %v982_v23, %v909_v29  ;;  %v1004_v34 = vadd.f32 %v1003_v24, %v925_v30 }
 0x129   : > { %v942_v3 = vadd.f32 %v941_v25, %v878_v63  ;;  %v963_v4 = vadd.f32 %v962_v26, %v894_v0 }
 0x12d   : > { %v805_v35 = vpop.f32.mrf.mxu2  ;;  %v845_v36 = vpop.f32.mrf.mxu3 }
 0x12e   : > { %v728_v37 = vpop.f32.mrf.mxu0  ;;  %v768_v38 = vpop.f32.mrf.mxu1  ;;  %v910_v15 = vmax.f32 %v805_v35, 0.0  ;;  %v926_v16 = vmax.f32 %v845_v36, 0.0 }
 0x12f   : > { %v879_v1 = vmax.f32 %v728_v37, 0.0  ;;  %v895_v2 = vmax.f32 %v768_v38, 0.0 }
 0x130   : > { %v984_v27 = vadd.f32 %v983_v33, %v910_v15  ;;  %v1005_v28 = vadd.f32 %v1004_v34, %v926_v16 }
 0x131   : > { %v943_v11 = vadd.f32 %v942_v3, %v879_v1  ;;  %v964_v12 = vadd.f32 %v963_v4, %v895_v2 }
 0x135   : > { %v2143_v39 = vpop.f32.mrf.mxu2  ;;  %v2145_v40 = vpop.f32.mrf.mxu3 }
 0x136   : > { %v730_v41 = vpop.f32.mrf.mxu0  ;;  %v770_v42 = vpop.f32.mrf.mxu1  ;;  %v911_v21 = vmax.f32 %v2143_v39, 0.0  ;;  %v927_v22 = vmax.f32 %v2145_v40, 0.0 }
 0x137   : > { %v880_v5 = vmax.f32 %v730_v41, 0.0  ;;  %v896_v6 = vmax.f32 %v770_v42, 0.0 }
 0x138   : > { %v985_v41 = vadd.f32 %v984_v27, %v911_v21  ;;  %v1006_v39 = vadd.f32 %v1005_v28, %v927_v22 }
 0x139   : > { %v944_v17 = vadd.f32 %v943_v11, %v880_v5  ;;  %v965_v18 = vadd.f32 %v964_v12, %v896_v6 }
 0x13d   : > { %v2147_v43 = vpop.f32.mrf.mxu2  ;;  %v2149_v44 = vpop.f32.mrf.mxu3 }
 0x13e   : > { %v733_v45 = vpop.f32.mrf.mxu0  ;;  %v773_v46 = vpop.f32.mrf.mxu1  ;;  %v912_v29 = vmax.f32 %v2147_v43, 0.0  ;;  %v928_v30 = vmax.f32 %v2149_v44, 0.0 }
 0x13f   : > { %v881_v13 = vmax.f32 %v733_v45, 0.0  ;;  %v897_v14 = vmax.f32 %v773_v46, 0.0 }
 0x141   : > { %v945_v23 = vadd.f32 %v944_v17, %v881_v13  ;;  %v966_v24 = vadd.f32 %v965_v18, %v897_v14 }
 0x145   : > { %v2151_v47 = vpop.f32.mrf.mxu2  ;;  %v2153_v48 = vpop.f32.mrf.mxu3 }
 0x146   : > { %v735_v49 = vpop.f32.mrf.mxu0  ;;  %v775_v50 = vpop.f32.mrf.mxu1  ;;  %v913_v40 = vmax.f32 %v2151_v47, 0.0  ;;  %v929_v42 = vmax.f32 %v2153_v48, 0.0 }
 0x147   : > { %v882_v19 = vmax.f32 %v735_v49, 0.0  ;;  %v898_v20 = vmax.f32 %v775_v50, 0.0  ;;  %v986_v49 = vadd.f32 %v985_v41, %v912_v29  ;;  %v1007_v50 = vadd.f32 %v1006_v39, %v928_v30 }
 0x149   : > { %v946_v31 = vadd.f32 %v945_v23, %v882_v19  ;;  %v967_v32 = vadd.f32 %v966_v24, %v898_v20  ;;  %v987_v0 = vadd.f32 %v986_v49, %v913_v40  ;;  %v1008_v48 = vadd.f32 %v1007_v50, %v929_v42 }
 0x14d   : > { %v2155_v51 = vpop.f32.mrf.mxu2  ;;  %v2157_v52 = vpop.f32.mrf.mxu3 }
 0x14e   : > { %v738_v53 = vpop.f32.mrf.mxu0  ;;  %v778_v54 = vpop.f32.mrf.mxu1 }
 0x14f   : > { %v883_v25 = vmax.f32 %v738_v53, 0.0  ;;  %v899_v26 = vmax.f32 %v778_v54, 0.0  ;;  %v914_v53 = vmax.f32 %v2155_v51, 0.0  ;;  %v930_v54 = vmax.f32 %v2157_v52, 0.0 }
 0x151   : > { %v947_v33 = vadd.f32 %v946_v31, %v883_v25  ;;  %v968_v34 = vadd.f32 %v967_v32, %v899_v26  ;;  %v988_v5 = vadd.f32 %v987_v0, %v914_v53  ;;  %v1009_v6 = vadd.f32 %v1008_v48, %v930_v54 }
 0x155   : > { %v2159_v55 = vpop.f32.mrf.mxu2  ;;  %v2161_v56 = vpop.f32.mrf.mxu3 }
 0x156   : > { %v740_v57 = vpop.f32.mrf.mxu0  ;;  %v780_v58 = vpop.f32.mrf.mxu1  ;;  %v915_v1 = vmax.f32 %v2159_v55, 0.0  ;;  %v931_v2 = vmax.f32 %v2161_v56, 0.0 }
 0x157   : > { %v884_v35 = vmax.f32 %v740_v57, 0.0  ;;  %v900_v36 = vmax.f32 %v780_v58, 0.0 }
 0x158   : > { %v989_v13 = vadd.f32 %v988_v5, %v915_v1  ;;  %v1010_v14 = vadd.f32 %v1009_v6, %v931_v2 }
 0x159   : > { %v948_v57 = vadd.f32 %v947_v33, %v884_v35  ;;  %v969_v58 = vadd.f32 %v968_v34, %v900_v36 }
 0x15d   : > { %v2163_v59 = vpop.f32.mrf.mxu2  ;;  %v2165_v60 = vpop.f32.mrf.mxu3 }
 0x15e   : > { %v2167_v61 = vpop.f32.mrf.mxu0  ;;  %v2169_v62 = vpop.f32.mrf.mxu1  ;;  %v916_v51 = vmax.f32 %v2163_v59, 0.0  ;;  %v932_v52 = vmax.f32 %v2165_v60, 0.0 }
 0x15f   : > { %v885_v43 = vmax.f32 %v2167_v61, 0.0  ;;  %v901_v44 = vmax.f32 %v2169_v62, 0.0 }
 0x160   : > { %v990_v21 = vadd.f32 %v989_v13, %v916_v51  ;;  %v1011_v59 = vadd.f32 %v1010_v14, %v932_v52 }
 0x161   : > { %v949_v3 = vadd.f32 %v948_v57, %v885_v43  ;;  %v970_v61 = vadd.f32 %v969_v58, %v901_v44 }
 0x165   : > { %v2171_v7 = vpop.f32.mrf.mxu2  ;;  %v2173_v8 = vpop.f32.mrf.mxu3 }
 0x166   : > { %v745_v9 = vpop.f32.mrf.mxu0  ;;  %v785_v10 = vpop.f32.mrf.mxu1  ;;  %v917_v55 = vmax.f32 %v2171_v7, 0.0  ;;  %v933_v56 = vmax.f32 %v2173_v8, 0.0 }
 0x167   : > { %v886_v63 = vmax.f32 %v745_v9, 0.0  ;;  %v902_v47 = vmax.f32 %v785_v10, 0.0 }
 0x168   : > { %v991_v25 = vadd.f32 %v990_v21, %v917_v55  ;;  %v1012_v26 = vadd.f32 %v1011_v59, %v933_v56 }
 0x169   : > { %v950_v11 = vadd.f32 %v949_v3, %v886_v63  ;;  %v971_v12 = vadd.f32 %v970_v61, %v902_v47 }
 0x16d   : > { %v825_v37 = vpop.f32.mrf.mxu2  ;;  %v865_v38 = vpop.f32.mrf.mxu3 }
 0x16e   : > { %v748_v45 = vpop.f32.mrf.mxu0  ;;  %v788_v46 = vpop.f32.mrf.mxu1  ;;  %v918_v22 = vmax.f32 %v825_v37, 0.0  ;;  %v934_v60 = vmax.f32 %v865_v38, 0.0 }
 0x16f   : > { %v887_v4 = vmax.f32 %v748_v45, 0.0  ;;  %v903_v62 = vmax.f32 %v788_v46, 0.0 }
 0x170   : > { %v992_v30 = vadd.f32 %v991_v25, %v918_v22  ;;  %v1013_v8 = vadd.f32 %v1012_v26, %v934_v60 }
 0x171   : > { %v951_v17 = vadd.f32 %v950_v11, %v887_v4  ;;  %v972_v18 = vadd.f32 %v971_v12, %v903_v62  ;;  %v937_v62 = vld [vmem:[#allocation2] sm:$0xf] }
 0x175   : > { %v828_v9 = vpop.f32.mrf.mxu2  ;;  %v868_v10 = vpop.f32.mrf.mxu3 }
 0x176   : > { %v750_v15 = vpop.f32.mrf.mxu0  ;;  %v790_v16 = vpop.f32.mrf.mxu1  ;;  %v919_v27 = vmax.f32 %v828_v9, 0.0  ;;  %v935_v28 = vmax.f32 %v868_v10, 0.0 }
 0x177   : > { %v888_v19 = vmax.f32 %v750_v15, 0.0  ;;  %v904_v20 = vmax.f32 %v790_v16, 0.0 }
 0x178   : > { %v993_v41 = vadd.f32 %v992_v30, %v919_v27  ;;  %v1014_v39 = vadd.f32 %v1013_v8, %v935_v28 }
 0x179   : > { %v952_v23 = vadd.f32 %v951_v17, %v888_v19  ;;  %v973_v24 = vadd.f32 %v972_v18, %v904_v20 }
 0x17b   : > { %v953_v29 = vrot.slane %v952_v23, 4  ;;  %v974_v7 = vrot.slane %v973_v24, 4 }
 0x17d   : > { %v954_v31 = vadd.f32 %v953_v29, %v952_v23  ;;  %v975_v32 = vadd.f32 %v974_v7, %v973_v24  ;;  %v830_v35 = vpop.f32.mrf.mxu2  ;;  %v870_v36 = vpop.f32.mrf.mxu3 }
 0x17e   : > { %v920_v40 = vmax.f32 %v830_v35, 0.0  ;;  %v936_v42 = vmax.f32 %v870_v36, 0.0 }
 0x17f   : > { %v955_v37 = vrot.slane %v954_v31, 2  ;;  %v976_v38 = vrot.slane %v975_v32, 2 }
 0x180   : > { %v994_v45 = vadd.f32 %v993_v41, %v920_v40  ;;  %v1015_v46 = vadd.f32 %v1014_v39, %v936_v42 }
 0x181   : > { %v956_v33 = vadd.f32 %v955_v37, %v954_v31  ;;  %v977_v34 = vadd.f32 %v976_v38, %v975_v32 }
 0x182   : > { %v995_v43 = vrot.slane %v994_v45, 4  ;;  %v1016_v44 = vrot.slane %v1015_v46, 4 }
 0x183   : > { %v957_v49 = vrot.slane %v956_v33, 1  ;;  %v978_v50 = vrot.slane %v977_v34, 1 }
 0x184   : > { %v996_v53 = vadd.f32 %v995_v43, %v994_v45  ;;  %v1017_v54 = vadd.f32 %v1016_v44, %v1015_v46 }
 0x185   : > { %v958_v57 = vadd.f32 %v957_v49, %v956_v33  ;;  %v979_v58 = vadd.f32 %v978_v50, %v977_v34 }
 0x186   : > { %v997_v63 = vrot.slane %v996_v53, 2  ;;  %v1018_v47 = vrot.slane %v1017_v54, 2 }
 0x187   : > { %v1027_v0 = vsel %vm1026_vm0, %v979_v58, %v958_v57 }
 0x188   : > { %v998_v48 = vadd.f32 %v997_v63, %v996_v53  ;;  %v1019_v1 = vadd.f32 %v1018_v47, %v1017_v54 }
 0x18a   : > { %v999_v2 = vrot.slane %v998_v48, 1  ;;  %v1020_v3 = vrot.slane %v1019_v1, 1 }
 0x18c   : > { %v1000_v61 = vadd.f32 %v999_v2, %v998_v48  ;;  %v1021_v4 = vadd.f32 %v1020_v3, %v1019_v1 }
 0x18e   : > { %v1029_v5 = vsel %vm1028_vm1, %v1000_v61, %v1027_v0  ;;  %1038 = sbr.rel (%p1463_p9) target bundleno = 690 (0x2b2), region = 60 }
 0x18f   : > { %v1031_v6 = vsel %vm1030_vm2, %v1021_v4, %v1029_v5 }
 0x190   : > { %v1033_v51 = vadd.f32 %v1031_v6, %v937_v62 }
 0x192   : > { %1034 = vst [vmem:[#allocation2] sm:$0xf] %v1033_v51 }
 0x193   : > { %v1056_v52 = vld [vmem:[%s2090_s5 + $0x78] sm:$0xff]  ;;  %v1055_v11 = vld [vmem:[%s2090_s5 + $0x70] sm:$0xff]  ;;  %v1054_v12 = vld [vmem:[%s2090_s5 + $0x68] sm:$0xff] }
 0x194   : > { %1057 = vmatpush.msra.mxu0 %v1056_v52  ;;  %v1053_v9 = vld [vmem:[%s2090_s5 + $0x60] sm:$0xff]  ;;  %v1093_v10 = vld [vmem:[%s2093_s26 + $0x78] sm:$0xff]  ;;  %v1092_v14 = vld [vmem:[%s2093_s26 + $0x70] sm:$0xff] }
 0x195   : > { %v1052_v13 = vld [vmem:[%s2090_s5 + $0x58] sm:$0xff]  ;;  %1094 = vmatpush.msra.mxu1 %v1093_v10  ;;  %v1091_v55 = vld [vmem:[%s2093_s26 + $0x68] sm:$0xff]  ;;  %v1051_v56 = vld [vmem:[%s2090_s5 + $0x50] sm:$0xff] }
 0x196   : > { %1058 = vmatpush.msra.mxu0 %v1055_v11  ;;  %v1090_v15 = vld [vmem:[%s2093_s26 + $0x60] sm:$0xff]  ;;  %v1050_v16 = vld [vmem:[%s2090_s5 + $0x48] sm:$0xff]  ;;  %v1089_v17 = vld [vmem:[%s2093_s26 + $0x58] sm:$0xff] }
 0x197   : > { %1095 = vmatpush.msra.mxu1 %v1092_v14  ;;  %v1049_v18 = vld [vmem:[%s2090_s5 + $0x40] sm:$0xff]  ;;  %v1088_v19 = vld [vmem:[%s2093_s26 + $0x50] sm:$0xff]  ;;  %v1048_v20 = vld [vmem:[%s2090_s5 + $0x38] sm:$0xff] }
 0x198   : > { %1059 = vmatpush.msra.mxu0 %v1054_v12  ;;  %v1087_v21 = vld [vmem:[%s2093_s26 + $0x48] sm:$0xff]  ;;  %v1047_v59 = vld [vmem:[%s2090_s5 + $0x30] sm:$0xff]  ;;  %v1086_v22 = vld [vmem:[%s2093_s26 + $0x40] sm:$0xff] }
 0x199   : > { %1096 = vmatpush.msra.mxu1 %v1091_v55  ;;  %v1046_v60 = vld [vmem:[%s2090_s5 + $0x28] sm:$0xff]  ;;  %v1085_v23 = vld [vmem:[%s2093_s26 + $0x38] sm:$0xff]  ;;  %v1045_v24 = vld [vmem:[%s2090_s5 + $0x20] sm:$0xff] }
 0x19a   : > { %1060 = vmatpush.msra.mxu0 %v1053_v9  ;;  %v1084_v25 = vld [vmem:[%s2093_s26 + $0x30] sm:$0xff]  ;;  %v1044_v26 = vld [vmem:[%s2090_s5 + $0x18] sm:$0xff]  ;;  %v1083_v27 = vld [vmem:[%s2093_s26 + $0x28] sm:$0xff] }
 0x19b   : > { %1097 = vmatpush.msra.mxu1 %v1090_v15  ;;  %v1043_v28 = vld [vmem:[%s2090_s5 + $0x10] sm:$0xff]  ;;  %v1039_v29 = vld [vmem:[#allocation2] sm:$0xf]  ;;  %v1082_v7 = vld [vmem:[%s2093_s26 + $0x20] sm:$0xff] }
 0x19c   : > { %1061 = vmatpush.msra.mxu0 %v1052_v13  ;;  %v1042_v30 = vld [vmem:[%s2090_s5 + $0x8] sm:$0xff]  ;;  %v1081_v8 = vld [vmem:[%s2093_s26 + $0x18] sm:$0xff]  ;;  %v1041_v31 = vld [vmem:[%s2090_s5] sm:$0xff]  ;;  %v1040_v32 = vmul.f32 0.00390625, %v1039_v29 }
 0x19d   : > { %1098 = vmatpush.msra.mxu1 %v1089_v17  ;;  %v1080_v35 = vld [vmem:[%s2093_s26 + $0x10] sm:$0xff]  ;;  %v1079_v36 = vld [vmem:[%s2093_s26 + $0x8] sm:$0xff]  ;;  %v1078_v41 = vld [vmem:[%s2093_s26] sm:$0xff] }
 0x19e   : > { %1062 = vmatpush.msra.mxu0 %v1051_v56 }
 0x19f   : > { %1099 = vmatpush.msra.mxu1 %v1088_v19 }
 0x1a0   : > { %1063 = vmatpush.msra.mxu0 %v1050_v16 }
 0x1a1   : > { %1100 = vmatpush.msra.mxu1 %v1087_v21 }
 0x1a2   : > { %1064 = vmatpush.msra.mxu0 %v1049_v18 }
 0x1a3   : > { %1101 = vmatpush.msra.mxu1 %v1086_v22 }
 0x1a4   : > { %1065 = vmatpush.msra.mxu0 %v1048_v20 }
 0x1a5   : > { %1102 = vmatpush.msra.mxu1 %v1085_v23 }
 0x1a6   : > { %1066 = vmatpush.msra.mxu0 %v1047_v59 }
 0x1a7   : > { %1103 = vmatpush.msra.mxu1 %v1084_v25 }
 0x1a8   : > { %1067 = vmatpush.msra.mxu0 %v1046_v60 }
 0x1a9   : > { %1104 = vmatpush.msra.mxu1 %v1083_v27 }
 0x1aa   : > { %1068 = vmatpush.msra.mxu0 %v1045_v24 }
 0x1ab   : > { %1105 = vmatpush.msra.mxu1 %v1082_v7 }
 0x1ac   : > { %1069 = vmatpush.msra.mxu0 %v1044_v26 }
 0x1ad   : > { %1106 = vmatpush.msra.mxu1 %v1081_v8 }
 0x1ae   : > { %1070 = vmatpush.msra.mxu0 %v1043_v28 }
 0x1af   : > { %1107 = vmatpush.msra.mxu1 %v1080_v35 }
 0x1b0   : > { %1071 = vmatpush.msra.mxu0 %v1042_v30 }
 0x1b1   : > { %1108 = vmatpush.msra.mxu1 %v1079_v36 }
 0x1b2   : > { %1072 = vmatpush.msra.mxu0 %v1041_v31 }
 0x1b3   : > { %1073 = vmatmul.f32.vlgmr.msra.gmra.mxu0 %v1040_v32  ;;  %1109 = vmatpush.msra.mxu1 %v1078_v41 }
 0x230   : > { %v1074_v39 = vpop.f32.mrf.mxu0 }
 0x231   : > { %v1077_v40 = vmax.f32 %v1074_v39, 0.0 }
 0x233   : > { %1110 = vmatmul.f32.vlgmr.msra.gmra.mxu1 %v1077_v40 }
 0x2b0   : > { %v1111_v42 = vpop.f32.mrf.mxu1 }
 0x2b1   : > { %1114 = vst [vmem:[%s2100_s20] sm:$0xf] %v1111_v42 }
 0x2b2 PF: > { %s1465_s13 = sshll.u32 %s1859_s22, 2  ;;  %s2313_s6 = sld [smem:[#allocation30_spill]] }
 0x2b3   : > { %s1128_s27 = sshll.u32 %s2100_s20, 4  ;;  %s1116_s17 = scalar_lea.sflag [#allocation5], %s2080_s23  ;;  %s1129_s27 = int_to_ptr.vmem [resolvable:$true] %s1128_s27 }
 0x2b8   : > { %s1126_s11 = scalar_lea.hbm %s2313_s6, %s1465_s13  ;;  %s1761_s22 = scalar_lea.hbm %s2313_s6, 8 }
 0x2b9   : > { %s1130_s4 = sshll.u32 %s1126_s11, 4  ;;  %s1131_s4 = int_to_ptr.hbm [resolvable:$true] %s1130_s4 }
 0x2ba   : > { %s1755_s14 = sshra.s32 %s1131_s4, 4  ;;  %s1756_s14 = int_to_ptr.hbm [resolvable:$true] %s1755_s14 }
 0x2bb   : > { %s1757_s18 = scalar_lea.hbm %s1756_s14, 4  ;;  %p1762_p13 = scmp.lt.s32.totalorder %s1756_s14, %s2313_s6 }
 0x2bc   : > { %p1758_p10 = scmp.ne.s32.totalorder %s1756_s14, %s1757_s18  ;;  %p1763_p0 = scmp.lt.s32.totalorder %s1761_s22, %s1757_s18 }
 0x2be   : > { %p1759_p11 = pnand %p1758_p10, %p2015_p4  ;;  %p1764_p1 = por %p1763_p0, %p1762_p13 }
 0x2c0   : > { %p1760_p12 = pneg %p1759_p11 }
 0x2c2   : > { %p1765_p6 = pnand %p1764_p1, %p1760_p12 }
 0x2c4   : > { %1768 = shalt.err (!%p1765_p6)
}
 0x2c5   : > { %1551 = dma.vmem_to_hbm [thread:$0]  (%p2015_p4), %s1129_s27, 64, %s1131_s4, %s1116_s17  }
 0x2c6 PF: > { %s2314_s23 = sld [smem:[#allocation19_spill]]  ;;  %p1557_p2 = scmp.ge.s32.totalorder %s1871_s25, 2 }
 0x2c8   : > { %p1554_p3 = pnand %p1557_p2, %p2019_p5 }
 0x2ca   : > { %p1555_p7 = pneg %p1554_p3 }
 0x2cc   : > { %s1142_s8 = sand.u32 1, %s2314_s23  }
 0x2cd   : > { %s1143_s5 = scalar_lea.sflag [#allocation5], %s1142_s8 }
 0x2ce   : > { %1826 = dma.done.wait (%p1555_p7), %s1143_s5, 64  }
 0x2cf   : > { %1828 = vsyncadd (%p1555_p7), %s1143_s5, 4294967232  ;;  %s26_s25 = sadd.s32 1, %s1871_s25   ;;  %s2316_s29 = sld [smem:[#allocation20_spill]] }
 0x2d0   : > { %p23_p8 = scmp.ge.s32.totalorder %s26_s25, 6   ;;  %s2317_s17 = sld [smem:[#allocation26_spill]] }
 0x2d1   : > { %s2318_s26 = sld [smem:[#allocation21_spill]]  ;;  %s2323_s15 = smov %s1835_s16 }
 0x2d2   : > { %s2319_s20 = sld [smem:[#allocation25_spill]]  ;;  %s2325_s18 = smov %s1847_s19 }
 0x2d3   : > { %s2320_s21 = sld [smem:[#allocation22_spill]]  ;;  %s2327_s22 = smov %s1867_s24 }
 0x2d4   : > { %s2321_s23 = sld [smem:[#allocation23_spill]] }
 0x2d5   : > { %s2322_s28 = sld [smem:[#allocation24_spill]]  ;;  %s2324_s16 = smov %s2316_s29 }
 0x2d7   : > { %s2326_s19 = smov %s2318_s26  ;;  %25 = sbr.rel (!%p23_p8) target bundleno = 16 (0x10), region = 131 }
 0x2db   : > { %s2328_s24 = smov %s2322_s28 }
 0x2dc   :  { %1149 = vsyncpa [#allocation4], 1 }
 0x2dd   :  { %1151 = vsyncpa [#allocation4 + $0x1], 1 }
 0x2de   :  { %1152 = vsyncpa [#allocation7], 1 }
 0x2df   :  { %1154 = vsyncpa [#allocation7 + $0x1], 1 }
 0x2e0   :  { %1155 = vsyncpa [#allocation10], 1 }
 0x2e1   :  { %1157 = vsyncpa [#allocation10 + $0x1], 1 }
 0x2e2   :  { %1158 = vsyncpa [#allocation5], 1 }
 0x2e3   :  { %1160 = vsyncpa [#allocation5 + $0x1], 1 }

</bundles_post_ra>
